<compile_context>
chip_gen: v5e
topology: v5e:2x2
jax: 0.10.0
libtpu: 0.0.40
codegen_flags: <defaults>
</compile_context>

<pallas_src>
import numpy as np
import jax
import jax.numpy as jnp
from jax.experimental import pallas as pl
from jax.experimental.pallas import tpu as pltpu


_LANES = 128
_SINGLE_BLOCK_MAX_BYTES = 1 << 20       # <= 1 MiB of x -> whole-array VMEM block
_TILE_TARGET_BYTES = 2 << 20            # ~2 MiB per operand tile on gridded path
_MAX_SEQ_BLOCK_ROWS = 4096


def _sinusoid_table(n_position: int, d_hid: int) -> jnp.ndarray:
    """Deterministic sinusoid position encoding table, shape (n_position, d_hid)."""
    pos = np.arange(n_position, dtype=np.float64)[:, None]          # (P, 1)
    hid = np.arange(d_hid, dtype=np.float64)[None, :]                # (1, D)
    angle = pos / np.power(10000.0, 2.0 * (hid // 2) / d_hid)        # (P, D)
    table = np.empty((n_position, d_hid), dtype=np.float64)
    table[:, 0::2] = np.sin(angle[:, 0::2])
    table[:, 1::2] = np.cos(angle[:, 1::2])
    return jnp.asarray(table, dtype=jnp.float32)


def _add_tile_kernel(x_ref, p_ref, o_ref):
    # Shape-matched elementwise add on a (s_blk, D) tile: pure vld + vadd + vst.
    o_ref[...] = x_ref[...] + p_ref[...]


def _add_full_kernel(x_ref, p_ref, o_ref):
    # Whole (B, S, D) array resident in VMEM; pos (S, D) reused across batch.
    o_ref[...] = x_ref[...] + p_ref[...][None, :, :]


def _choose_seq_block(seq_len: int, d_pad: int) -> int:
    """Pick a sequence-tile row count: ~2 MiB per operand, multiple of 8."""
    rows = _TILE_TARGET_BYTES // (d_pad * 4)
    rows = max(8, min(_MAX_SEQ_BLOCK_ROWS, (rows // 8) * 8))
    if seq_len <= rows:
        return seq_len          # full extent block (always legal)
    return rows


def positional_encoding(x: jnp.ndarray, pos_table: jnp.ndarray,
                        *, donate_x: bool = False) -> jnp.ndarray:
    """x: (B, S, D); pos_table: (n_position, D). Returns x + pos_table[:S]."""
    B, S, D = x.shape
    n_position = pos_table.shape[0]
    assert S <= n_position, f"sequence length {S} exceeds n_position {n_position}"

    pos = pos_table[:S].astype(x.dtype)                       # (S, D), no batch bcast

    # Lane-dense last dim: pad D up to a multiple of 128 only if needed.
    d_pad = ((D + _LANES - 1) // _LANES) * _LANES
    if d_pad != D:
        x_in = jnp.pad(x, ((0, 0), (0, 0), (0, d_pad - D)))
        pos_in = jnp.pad(pos, ((0, 0), (0, d_pad - D)))
    else:
        x_in, pos_in = x, pos

    aliases = {0: 0} if (donate_x and d_pad == D) else {}
    out_shape = jax.ShapeDtypeStruct((B, S, d_pad), x.dtype)

    x_bytes = B * S * d_pad * x_in.dtype.itemsize

    if x_bytes <= _SINGLE_BLOCK_MAX_BYTES:
        # Tiny inputs: one whole-array VMEM block, no grid, no per-step overhead.
        out = pl.pallas_call(
            _add_full_kernel,
            out_shape=out_shape,
            in_specs=[
                pl.BlockSpec(memory_space=pltpu.MemorySpace.VMEM),
                pl.BlockSpec(memory_space=pltpu.MemorySpace.VMEM),
            ],
            out_specs=pl.BlockSpec(memory_space=pltpu.MemorySpace.VMEM),
            input_output_aliases=aliases,
        )(x_in, pos_in)
    else:
        # Gridded path: grid = (seq tiles, batch). The pos BlockSpec ignores the
        # batch axis, so the same table tile stays VMEM-resident across batch
        # iterations (no broadcast copy, no re-DMA between consecutive steps).
        s_blk = _choose_seq_block(S, d_pad)
        grid = (pl.cdiv(S, s_blk), B)
        out = pl.pallas_call(
            _add_tile_kernel,
            out_shape=out_shape,
            grid_spec=pl.GridSpec(
                grid=grid,
                in_specs=[
                    pl.BlockSpec((None, s_blk, d_pad), lambda s, b: (b, s, 0)),
                    pl.BlockSpec((s_blk, d_pad), lambda s, b: (s, 0)),
                ],
                out_specs=pl.BlockSpec((None, s_blk, d_pad), lambda s, b: (b, s, 0)),
            ),
            compiler_params=pltpu.CompilerParams(
                dimension_semantics=("parallel", "parallel"),
                vmem_limit_bytes=32 * 1024 * 1024,
            ),
            input_output_aliases=aliases,
        )(x_in, pos_in)

    if d_pad != D:
        out = out[:, :, :D]
    return out


if __name__ == "__main__":
    key = jax.random.PRNGKey(0)
    n_position = 200

    # Case 1: tiny module-consistent shapes (B=2, S=8, D=32) -> single-block
    # path with D padded 32 -> 128 so all stores stay full-lane.
    B, S, D = 2, 8, 32
    k1, k2 = jax.random.split(key)
    x_small = jax.random.normal(k1, (B, S, D), dtype=jnp.float32)
    tbl_small = _sinusoid_table(n_position, D)
    out_small = jax.block_until_ready(positional_encoding(x_small, tbl_small))
    ref_small = x_small + tbl_small[None, :S, :]
    np.testing.assert_allclose(np.asarray(out_small), np.asarray(ref_small),
                               rtol=1e-6, atol=1e-6)

    # Case 2: real transformer width (d_model=512, D % 128 == 0) -> gridded
    # path, pos table tile reused across the batch grid axis, no padding.
    B2, S2, D2 = 3, 200, 512
    x_med = jax.random.normal(k2, (B2, S2, D2), dtype=jnp.float32)
    tbl_med = _sinusoid_table(n_position, D2)
    out_med = jax.block_until_ready(positional_encoding(x_med, tbl_med))
    ref_med = x_med + tbl_med[None, :S2, :]
    np.testing.assert_allclose(np.asarray(out_med), np.asarray(ref_med),
                               rtol=1e-6, atol=1e-6)

    print("KERNEL_OK")
</pallas_src>

<mosaic_0001>
module attributes {stable_mosaic.version = 11 : i64} {
  func.func @_add_full_kernel(%arg0: memref<2x8x128xf32, #tpu.memory_space<vmem>>, %arg1: memref<8x128xf32, #tpu.memory_space<vmem>>, %arg2: memref<2x8x128xf32, #tpu.memory_space<vmem>>) attributes {dimension_semantics = [], scalar_prefetch = 0 : i64, scratch_operands = 0 : i64, tpu.core_type = #tpu.core_type<tc>} {
    %c0 = arith.constant 0 : index
    %c0_0 = arith.constant 0 : index
    %c0_1 = arith.constant 0 : index
    %0 = vector.load %arg0[%c0, %c0_0, %c0_1] : memref<2x8x128xf32, #tpu.memory_space<vmem>>, vector<2x8x128xf32>
    %c0_2 = arith.constant 0 : index
    %c0_3 = arith.constant 0 : index
    %1 = vector.load %arg1[%c0_2, %c0_3] : memref<8x128xf32, #tpu.memory_space<vmem>>, vector<8x128xf32>
    %2 = vector.shape_cast %1 : vector<8x128xf32> to vector<1x8x128xf32>
    %3 = vector.broadcast %2 : vector<1x8x128xf32> to vector<2x8x128xf32>
    %4 = arith.addf %0, %3 : vector<2x8x128xf32>
    %c0_4 = arith.constant 0 : index
    %c0_5 = arith.constant 0 : index
    %c0_6 = arith.constant 0 : index
    %5 = vector.load %arg2[%c0_4, %c0_5, %c0_6] : memref<2x8x128xf32, #tpu.memory_space<vmem>>, vector<2x8x128xf32>
    tpu.vector_store %arg2[%c0_4, %c0_5, %c0_6], %4 {strides = array<i32>} : memref<2x8x128xf32, #tpu.memory_space<vmem>>, vector<2x8x128xf32>,
    return
  }
}

</mosaic_0001>

<bundles_post_ra>
// kernel: tpu_custom_call.1
= control target key start
LH: loop header
LB: loop body
LE: loop exit
PB: predicated region body
PF: predicated region fallthrough
CT: control target
= control target key end

     0   :  { %7 = vsyncpa [#allocation3], 0  ;;  %s181_s0 = inlined_call_operand.hbm [shape: f32[2,8,128], index: 0, kind: input, shape index: {}]   ;;  %s182_s1 = inlined_call_operand.hbm [shape: f32[8,128], index: 1, kind: input, shape index: {}]   ;;  %s183_s2 = inlined_call_operand.hbm [shape: f32[2,8,128], index: 2, kind: output, shape index: {}]  }
   0x1   :  { %8 = vsyncpa [#allocation6], 0 }
   0x2   :  { %9 = vsyncpa [#allocation4], 0  ;;  %s14_s11 = sshll.u32 %s181_s0, 4  ;;  %s152_s12 = smov [#allocation2]   ;;  %s15_s11 = int_to_ptr.hbm [resolvable:$true] %s14_s11 }
   0x3   :  { %s16_s13 = sshll.u32 %s152_s12, 4  ;;  %s28_s16 = sshll.u32 %s182_s1, 4  ;;  %s17_s13 = int_to_ptr.vmem [resolvable:$true] %s16_s13  ;;  %s29_s16 = int_to_ptr.hbm [resolvable:$true] %s28_s16 }
   0x4   :  { %s153_s17 = smov 128   ;;  %s154_s18 = smov 8  }
   0x5   :  { %22 = dma.hbm_to_vmem [thread:$0]  %s15_s11, 256, %s17_s13, [#allocation3], %s153_s17, %s153_s17, %s154_s18  }
   0x6   :  { %s155_s19 = smov [#allocation5]  }
   0x7   :  { %s30_s20 = sshll.u32 %s155_s19, 4  ;;  %s31_s20 = int_to_ptr.vmem [resolvable:$true] %s30_s20 }
   0x8   :  { %33 = dma.hbm_to_vmem [thread:$0]  %s29_s16, 128, %s31_s20, [#allocation6]  }
   0x9   :  { %146 = dma.done.wait [#allocation3], 256  }
   0xa   :  { %147 = vsyncadd [#allocation3], 4294967040 }
   0xb   :  { %148 = dma.done.wait [#allocation6], 128  }
   0xc   :  { %149 = vsyncadd [#allocation6], 4294967168  ;;  %s156_s0 = smov [#allocation7]   ;;  %s55_s24 = sshll.u32 %s183_s2, 4  ;;  %v42_v0 = vld [vmem:[#allocation2] sm:$0xff]  ;;  %v44_v1 = vld [vmem:[#allocation5] sm:$0xff]  ;;  %s56_s24 = int_to_ptr.hbm [resolvable:$true] %s55_s24 }
   0xd   :  { %s53_s21 = sshll.u32 %s156_s0, 4  ;;  %v43_v2 = vld [vmem:[#allocation2 + $0x8] sm:$0xff]  ;;  %v45_v3 = vadd.f32 %v44_v1, %v42_v0  ;;  %s54_s21 = int_to_ptr.vmem [resolvable:$true] %s53_s21 }
   0xe   :  { %v46_v4 = vadd.f32 %v44_v1, %v43_v2 }
   0xf   :  { %47 = vst [vmem:[#allocation7] sm:$0xff] %v45_v3 }
  0x10   :  { %48 = vst [vmem:[#allocation7 + $0x8] sm:$0xff] %v46_v4 }
  0x11   :  { %61 = dma.vmem_to_hbm [thread:$0]  %s54_s21, 256, %s56_s24, [#allocation4], %s153_s17, %s153_s17, %s154_s18  }
  0x12   :  { %150 = dma.done.wait [#allocation4], 256  }
  0x13   :  { %151 = vsyncadd [#allocation4], 4294967040 }
  0x14   :  { %66 = vsyncpa [#allocation3], 1 }
  0x15   :  { %67 = vsyncpa [#allocation6], 1 }
  0x16   :  { %68 = vsyncpa [#allocation4], 1 }

</bundles_post_ra>
